<compile_context>
chip_gen: v6e
topology: v6e:2x2x1
jax: 0.10.0
libtpu: 0.0.40
codegen_flags: <defaults>
</compile_context>

<pallas_src>
import functools

import jax
import jax.numpy as jnp
from jax.experimental import pallas as pl
from jax.experimental.pallas import tpu as pltpu


# ----------------------------- helpers --------------------------------------

def _round_up(n, m):
    return ((n + m - 1) // m) * m


def _dtype_bytes(dtype):
    return jnp.dtype(dtype).itemsize


def _vmem_tile_bytes(shape, itemsize):
    """Rough VMEM footprint of one block, honoring (sublane, 128-lane) padding."""
    if not shape:
        return itemsize
    dims = list(shape)
    sublane = 8 * max(1, 4 // itemsize)        # 8 rows f32, 16 bf16, 32 int8
    dims[-1] = _round_up(dims[-1], 128)
    if len(dims) >= 2:
        dims[-2] = _round_up(dims[-2], sublane)
    n = 1
    for d in dims:
        n *= d
    return n * itemsize


def _scoped_vmem_limit_bytes():
    """Generation-aware scoped-VMEM budget (~70% of per-core physical VMEM)."""
    try:
        cap = int(pltpu.get_tpu_info().vmem_capacity_bytes)
        if cap > 0:
            return max(32 * 1024 * 1024, min(int(cap * 0.7), 96 * 1024 * 1024))
    except Exception:
        pass
    return 48 * 1024 * 1024                     # safe on all generations


def _step_vmem_bytes(gb, rep, cin, hid, cout_p, x_itemsize, out_itemsize):
    """Estimated per-grid-step VMEM footprint for GB groups (double-buffered)."""
    m = gb * rep
    streamed = (
        _vmem_tile_bytes((m, cin), x_itemsize)           # x rows
        + _vmem_tile_bytes((gb, cin, hid), 2)            # dW0 (bf16)
        + _vmem_tile_bytes((gb, 1, hid), 4)              # folded bias 0 (f32)
        + _vmem_tile_bytes((gb, hid, cout_p), 2)         # dW1 (bf16)
        + _vmem_tile_bytes((gb, 1, cout_p), 4)           # folded bias 1 (f32)
        + _vmem_tile_bytes((m, cout_p), out_itemsize)    # output rows
    )
    shared = _vmem_tile_bytes((cin, hid), 2) + _vmem_tile_bytes((hid, cout_p), 2)
    # In-kernel temporaries: bf16 x/h copies + f32 partial results.
    temps = (
        _vmem_tile_bytes((m, cin), 2)
        + _vmem_tile_bytes((m, hid), 4) + _vmem_tile_bytes((m, hid), 2)
        + _vmem_tile_bytes((m, cout_p), 4)
    )
    # Conservative: count the shared weights double-buffered too (covers the
    # fallback path when pl.Buffered(1) is not honored).
    return 2 * (streamed + shared) + temps


def _pick_group_block(G, rep, cin, hid, cout_p, x_itemsize, out_itemsize, vmem_budget):
    """Largest VMEM-fitting GB (groups per grid step).

    Constraints: GB divides G; the block row count GB*rep is sublane-aligned
    (or the block is the whole batch); GB <= G//2 when G >= 2 so the grid has
    >= 2 steps and the second v7x TensorCore participates (even grid length
    preferred).  Larger GB => larger M = GB*rep for MXU row occupancy and
    longer back-to-back dW DMAs on this HBM-bound kernel.
    """
    def ok_rows(gb):
        return (gb * rep) % 8 == 0 or gb == G

    cap = G // 2 if G >= 2 else 1
    cands = [d for d in range(1, max(cap, 1) + 1)
             if G % d == 0 and ok_rows(d)
             and _step_vmem_bytes(d, rep, cin, hid, cout_p,
                                  x_itemsize, out_itemsize) <= vmem_budget]
    if not cands:
        # TODO(synk): for very large Cin*Hid (esp. v7x's 64 MiB VMEM) add a
        # Cin K-tiling grid axis with an f32 accumulator instead of shrinking GB.
        cands = [d for d in range(1, G + 1) if G % d == 0 and ok_rows(d)][:1] or [G]
    best = max(cands)
    even = [d for d in cands if (G // d) % 2 == 0]
    if even and 2 * max(even) >= best:
        best = max(even)
    return best


# ----------------------------- packing (one-time) ----------------------------

def pack_rep_mlp2l_params(params, d_params):
    """One-time parameter prep (module-state style; re-run only when the static
    params or the per-group deltas change, e.g. after update_wrt_loss):
      * static + dynamic weights cast to bf16 (MXU input dtype),
      * layer-1 N dimension zero-padded to a multiple of 128 lanes,
      * per-group biases folded: b_eff_g = b + db_g (kept f32).
    Keeping this out of the forward path removes the per-call cast/pad/fold
    HBM traffic that would otherwise roughly double the dominant delta stream.
    """
    w0, b0, w1, b1 = params
    dw0, db0, dw1, db1 = d_params
    Cin, Hid = w0.shape
    Hid1, Cout = w1.shape
    assert Hid1 == Hid
    G = dw0.shape[0]
    assert dw0.shape == (G, Cin, Hid) and dw1.shape == (G, Hid, Cout)
    assert db0.shape == (G, Hid) and db1.shape == (G, Cout)

    Cout_p = _round_up(Cout, 128)
    pad_n = Cout_p - Cout
    f32 = jnp.float32

    # TODO(synk): store dW0/dW1 as fp8 (v7x) / int8 (v5e,v6e) with a per-group
    # scale and dequantize the f32 correction accumulator in-kernel; halves the
    # dominant HBM stream.
    return {
        "w0": w0.astype(jnp.bfloat16),
        "dw0": dw0.astype(jnp.bfloat16),
        "be0": (b0.astype(f32)[None, :] + db0.astype(f32)).reshape(G, 1, Hid),
        "w1": jnp.pad(w1.astype(f32), ((0, 0), (0, pad_n))).astype(jnp.bfloat16),
        "dw1": jnp.pad(dw1.astype(f32), ((0, 0), (0, 0), (0, pad_n))).astype(jnp.bfloat16),
        "be1": jnp.pad(b1.astype(f32)[None, :] + db1.astype(f32),
                       ((0, 0), (0, pad_n))).reshape(G, 1, Cout_p),
        "cout": Cout,
    }


# ----------------------------- kernel ----------------------------------------

def _rep_mlp2l_kernel(x_ref, w0_ref, dw0_ref, be0_ref, w1_ref, dw1_ref, be1_ref,
                      o_ref, *, gb, rep):
    # x_ref:   (GB*rep, Cin)     input dtype — GB consecutive groups, flat rows
    # w0_ref:  (Cin, Hid)        bf16  shared static weights (layer 0)
    # dw0_ref: (GB, Cin, Hid)    bf16  per-group dynamic deltas (layer 0)
    # be0_ref: (GB, 1, Hid)      f32   folded bias b0 + db0_g
    # w1_ref:  (Hid, Cout_p)     bf16  shared static weights (layer 1, lane-padded)
    # dw1_ref: (GB, Hid, Cout_p) bf16
    # be1_ref: (GB, 1, Cout_p)   f32
    # o_ref:   (GB*rep, Cout_p)  input dtype — lane-dense output rows
    f32 = jnp.float32
    xf = x_ref[...].astype(jnp.bfloat16)          # the only live bf16 copy of x

    # ---- layer 0: full-M shared matmul + small per-group correction dots ----
    h_shared = jnp.dot(xf, w0_ref[...], preferred_element_type=f32)   # (M, Hid)
    h_parts = []
    for g in range(gb):                           # static unroll, gb is small
        rows = slice(g * rep, (g + 1) * rep)
        hg = h_shared[rows] + jnp.dot(xf[rows], dw0_ref[g],
                                      preferred_element_type=f32)
        hg = jnp.tanh(hg + be0_ref[g])            # bias + tanh stay f32 (v5e: no bf16 VPU/EUP)
        h_parts.append(hg.astype(jnp.bfloat16))
    hf = h_parts[0] if gb == 1 else jnp.concatenate(h_parts, axis=0)  # (M, Hid) bf16

    # ---- layer 1: full-M shared matmul (lane-padded N) + correction ---------
    y_shared = jnp.dot(hf, w1_ref[...], preferred_element_type=f32)   # (M, Cout_p)
    for g in range(gb):
        rows = slice(g * rep, (g + 1) * rep)
        yg = y_shared[rows] + jnp.dot(h_parts[g], dw1_ref[g],
                                      preferred_element_type=f32)
        o_ref[rows, :] = (yg + be1_ref[g]).astype(o_ref.dtype)        # 128-lane dense store


# ----------------------------- forward ---------------------------------------

def rep_dynamic_mlp2l_forward_packed(x_list, packed, rep_num, groups_per_step=None):
    """Forward pass using pre-packed parameters (see pack_rep_mlp2l_params)."""
    assert len(x_list) == 1
    x = x_list[0]
    B = x.shape[0]
    assert B % rep_num == 0
    G = B // rep_num

    w0_b, dw0_b, be0 = packed["w0"], packed["dw0"], packed["be0"]
    w1_b, dw1_b, be1 = packed["w1"], packed["dw1"], packed["be1"]
    Cout = packed["cout"]
    Cin, Hid = w0_b.shape
    Cout_p = w1_b.shape[1]
    assert dw0_b.shape[0] == G

    x2 = x.reshape(B, -1)                         # x.view(x.size(0), -1); keep input dtype
    assert x2.shape[1] == Cin
    out_dtype = x2.dtype                          # preserve caller's dtype (as PyTorch does)

    vmem_limit = _scoped_vmem_limit_bytes()
    if groups_per_step is None:
        GB = _pick_group_block(G, rep_num, Cin, Hid, Cout_p,
                               _dtype_bytes(x2.dtype), _dtype_bytes(out_dtype),
                               vmem_budget=vmem_limit // 2)
    else:
        GB = groups_per_step
    assert G % GB == 0
    grid = (G // GB,)
    M = GB * rep_num

    kernel = functools.partial(_rep_mlp2l_kernel, gb=GB, rep=rep_num)

    def build_in_specs(shared_pipeline_mode):
        shared_kw = ({} if shared_pipeline_mode is None
                     else {"pipeline_mode": shared_pipeline_mode})
        return [
            pl.BlockSpec((M, Cin), lambda g: (g, 0)),                    # x rows of GB groups
            pl.BlockSpec((Cin, Hid), lambda g: (0, 0), **shared_kw),     # W0 (shared)
            pl.BlockSpec((GB, Cin, Hid), lambda g: (g, 0, 0)),           # dW0 (per group)
            pl.BlockSpec((GB, 1, Hid), lambda g: (g, 0, 0)),             # b0 + db0_g
            pl.BlockSpec((Hid, Cout_p), lambda g: (0, 0), **shared_kw),  # W1 (shared, padded)
            pl.BlockSpec((GB, Hid, Cout_p), lambda g: (g, 0, 0)),        # dW1 (per group)
            pl.BlockSpec((GB, 1, Cout_p), lambda g: (g, 0, 0)),          # b1 + db1_g
        ]

    def run(shared_pipeline_mode):
        return pl.pallas_call(
            kernel,
            out_shape=jax.ShapeDtypeStruct((B, Cout_p), out_dtype),
            grid_spec=pltpu.PrefetchScalarGridSpec(
                num_scalar_prefetch=0,
                grid=grid,
                in_specs=build_in_specs(shared_pipeline_mode),
                out_specs=pl.BlockSpec((M, Cout_p), lambda g: (g, 0)),
            ),
            compiler_params=pltpu.CompilerParams(
                dimension_semantics=("parallel",),
                vmem_limit_bytes=vmem_limit,
            ),
        )(x2, w0_b, dw0_b, be0, w1_b, dw1_b, be1)

    # Shared weights never change across the grid -> request single buffering
    # (frees Cin*Hid + Hid*Cout_p bf16 of VMEM); fall back gracefully if this
    # Pallas version rejects the pipeline_mode hint.
    try:
        mode = pl.Buffered(1) if hasattr(pl, "Buffered") else None
    except Exception:
        mode = None
    try:
        out = run(mode)
    except Exception:
        if mode is None:
            raise
        out = run(None)

    return [out[:, :Cout]]


def rep_dynamic_mlp2l_forward(x_list, params, d_params, rep_num, groups_per_step=None):
    """Convenience path: packs params (normally a one-time, per-d-param-update
    step, not a per-forward step) and runs the packed forward."""
    packed = pack_rep_mlp2l_params(params, d_params)
    return rep_dynamic_mlp2l_forward_packed(x_list, packed, rep_num,
                                            groups_per_step=groups_per_step)


# ----------------------------- references ------------------------------------

def _reference_forward(x_list, params, d_params, rep_num):
    """Pure-JAX f32 reference mirroring the PyTorch einsum formulation."""
    x = x_list[0]
    B = x.shape[0]
    x2 = x.reshape(B, -1).astype(jnp.float32)
    w0, b0, w1, b1 = params
    dw0, db0, dw1, db1 = d_params
    rep = lambda d: jnp.repeat(d, rep_num, axis=0)       # repeat_d_params
    hp = jax.lax.Precision.HIGHEST
    w0e = w0[None] + rep(dw0)                            # (B, Cin, Hid)
    h = jnp.einsum('bq,bqo->bo', x2, w0e, precision=hp) + b0[None] + rep(db0)
    h = jnp.tanh(h)
    w1e = w1[None] + rep(dw1)                            # (B, Hid, Cout)
    y = jnp.einsum('bq,bqo->bo', h, w1e, precision=hp) + b1[None] + rep(db1)
    return [y]


def _reference_forward_bf16(x_list, params, d_params, rep_num):
    """Reference with the same bf16 quantization points as the kernel."""
    q = lambda a: a.astype(jnp.bfloat16).astype(jnp.float32)
    x = x_list[0]
    B = x.shape[0]
    x2 = q(x.reshape(B, -1).astype(jnp.float32))
    w0, b0, w1, b1 = params
    dw0, db0, dw1, db1 = d_params
    rep = lambda d: jnp.repeat(d, rep_num, axis=0)
    hp = jax.lax.Precision.HIGHEST
    w0e = q(w0)[None] + rep(q(dw0))
    h = jnp.einsum('bq,bqo->bo', x2, w0e, precision=hp) + b0[None] + rep(db0)
    h = q(jnp.tanh(h))
    w1e = q(w1)[None] + rep(q(dw1))
    y = jnp.einsum('bq,bqo->bo', h, w1e, precision=hp) + b1[None] + rep(db1)
    return [y]


# ----------------------------- demo / test -----------------------------------

if __name__ == "__main__":
    # Small, forward-consistent shapes:
    #   batch B=16, rep_num=8 -> G=2 groups (grid of 2 parallel steps)
    #   input feature map (B, 4, 2, 2) -> Cin = 16, hid = 32, out = 16
    B, C, H, W = 16, 4, 2, 2
    rep_num = 8
    G = B // rep_num
    Cin, Hid, Cout = C * H * W, 32, 16

    key = jax.random.PRNGKey(0)
    keys = jax.random.split(key, 9)

    x = jax.random.normal(keys[0], (B, C, H, W), dtype=jnp.float32)

    # Static parameters (module __init__ uses zeros; use deterministic normals
    # so the matmul path is actually exercised).
    w0 = 0.1 * jax.random.normal(keys[1], (Cin, Hid), dtype=jnp.float32)
    b0 = 0.1 * jax.random.normal(keys[2], (Hid,), dtype=jnp.float32)
    w1 = 0.1 * jax.random.normal(keys[3], (Hid, Cout), dtype=jnp.float32)
    b1 = 0.1 * jax.random.normal(keys[4], (Cout,), dtype=jnp.float32)

    # Per-group dynamic deltas (init_d_params allocates [B // rep_num, *shape]).
    dw0 = 0.05 * jax.random.normal(keys[5], (G, Cin, Hid), dtype=jnp.float32)
    db0 = 0.05 * jax.random.normal(keys[6], (G, Hid), dtype=jnp.float32)
    dw1 = 0.05 * jax.random.normal(keys[7], (G, Hid, Cout), dtype=jnp.float32)
    db1 = 0.05 * jax.random.normal(keys[8], (G, Cout), dtype=jnp.float32)

    params = (w0, b0, w1, b1)
    d_params = (dw0, db0, dw1, db1)

    # One-time packing (module-state style), then the packed forward.
    packed = pack_rep_mlp2l_params(params, d_params)
    out = rep_dynamic_mlp2l_forward_packed([x], packed, rep_num)
    y = jax.block_until_ready(out[0])
    assert y.shape == (B, Cout)
    assert y.dtype == x.dtype

    # Tight check vs a reference that applies the same bf16 quantization points.
    ref_q = _reference_forward_bf16([x], params, d_params, rep_num)[0]
    assert jnp.allclose(y, ref_q, atol=2e-3, rtol=2e-3), "mismatch vs bf16-quantized reference"

    # Loose check vs the exact f32 PyTorch-semantics reference.
    ref_f = _reference_forward([x], params, d_params, rep_num)[0]
    assert jnp.allclose(y, ref_f, atol=5e-2, rtol=5e-2), "mismatch vs f32 reference"

    print("KERNEL_OK")
</pallas_src>

<mosaic_0001>
module attributes {stable_mosaic.version = 11 : i64} {
  func.func @_rep_mlp2l_kernel(%arg0: i32, %arg1: memref<8x16xf32, #tpu.memory_space<vmem>>, %arg2: memref<16x32xbf16, #tpu.memory_space<vmem>>, %arg3: memref<1x16x32xbf16, #tpu.memory_space<vmem>>, %arg4: memref<1x1x32xf32, #tpu.memory_space<vmem>>, %arg5: memref<32x128xbf16, #tpu.memory_space<vmem>>, %arg6: memref<1x32x128xbf16, #tpu.memory_space<vmem>>, %arg7: memref<1x1x128xf32, #tpu.memory_space<vmem>>, %arg8: memref<8x128xf32, #tpu.memory_space<vmem>>) attributes {dimension_semantics = [#tpu.dimension_semantics<parallel>], iteration_bounds = array<i64: 2>, scalar_prefetch = 0 : i64, scratch_operands = 0 : i64, tpu.core_type = #tpu.core_type<tc>, window_params = [{transform_indices = @transform_0, window_bounds = array<i64: 8, 16>}, {pipeline_mode = #tpu.pipeline_mode<synchronous>, transform_indices = @transform_1, window_bounds = array<i64: 16, 32>}, {transform_indices = @transform_2, window_bounds = array<i64: 1, 16, 32>}, {transform_indices = @transform_3, window_bounds = array<i64: 1, 1, 32>}, {pipeline_mode = #tpu.pipeline_mode<synchronous>, transform_indices = @transform_4, window_bounds = array<i64: 32, 128>}, {transform_indices = @transform_5, window_bounds = array<i64: 1, 32, 128>}, {transform_indices = @transform_6, window_bounds = array<i64: 1, 1, 128>}, {transform_indices = @transform_7, window_bounds = array<i64: 8, 128>}]} {
    %c0 = arith.constant 0 : index
    %c0_0 = arith.constant 0 : index
    %0 = vector.load %arg1[%c0, %c0_0] : memref<8x16xf32, #tpu.memory_space<vmem>>, vector<8x16xf32>
    %1 = arith.truncf %0 : vector<8x16xf32> to vector<8x16xbf16>
    %c0_1 = arith.constant 0 : index
    %c0_2 = arith.constant 0 : index
    %2 = vector.load %arg2[%c0_1, %c0_2] : memref<16x32xbf16, #tpu.memory_space<vmem>>, vector<16x32xbf16>
    %cst = arith.constant dense<0.000000e+00> : vector<8x32xf32>
    %3 = tpu.matmul %1, %2, %cst {dimension_numbers = #tpu.dot_dimension_numbers<[1], [0], [0], [1], [0, 0, 1, 1], [], []>} : vector<8x16xbf16>, vector<16x32xbf16>, vector<8x32xf32> -> vector<8x32xf32>
    %c0_3 = arith.constant 0 : index
    %c0_4 = arith.constant 0 : index
    %c0_5 = arith.constant 0 : index
    %4 = vector.load %arg3[%c0_3, %c0_4, %c0_5] : memref<1x16x32xbf16, #tpu.memory_space<vmem>>, vector<1x16x32xbf16>
    %5 = vector.shape_cast %4 : vector<1x16x32xbf16> to vector<16x32xbf16>
    %cst_6 = arith.constant dense<0.000000e+00> : vector<8x32xf32>
    %6 = tpu.matmul %1, %5, %cst_6 {dimension_numbers = #tpu.dot_dimension_numbers<[1], [0], [0], [1], [0, 0, 1, 1], [], []>} : vector<8x16xbf16>, vector<16x32xbf16>, vector<8x32xf32> -> vector<8x32xf32>
    %7 = arith.addf %3, %6 : vector<8x32xf32>
    %c0_7 = arith.constant 0 : index
    %c0_8 = arith.constant 0 : index
    %c0_9 = arith.constant 0 : index
    %8 = vector.load %arg4[%c0_7, %c0_8, %c0_9] : memref<1x1x32xf32, #tpu.memory_space<vmem>>, vector<1x1x32xf32>
    %9 = vector.shape_cast %8 : vector<1x1x32xf32> to vector<1x32xf32>
    %10 = vector.broadcast %9 : vector<1x32xf32> to vector<8x32xf32>
    %11 = arith.addf %7, %10 : vector<8x32xf32>
    %12 = math.tanh %11 : vector<8x32xf32>
    %13 = arith.truncf %12 : vector<8x32xf32> to vector<8x32xbf16>
    %c0_10 = arith.constant 0 : index
    %c0_11 = arith.constant 0 : index
    %14 = vector.load %arg5[%c0_10, %c0_11] : memref<32x128xbf16, #tpu.memory_space<vmem>>, vector<32x128xbf16>
    %cst_12 = arith.constant dense<0.000000e+00> : vector<8x128xf32>
    %15 = tpu.matmul %13, %14, %cst_12 {dimension_numbers = #tpu.dot_dimension_numbers<[1], [0], [0], [1], [0, 0, 1, 1], [], []>} : vector<8x32xbf16>, vector<32x128xbf16>, vector<8x128xf32> -> vector<8x128xf32>
    %c0_13 = arith.constant 0 : index
    %c0_14 = arith.constant 0 : index
    %c0_15 = arith.constant 0 : index
    %16 = vector.load %arg6[%c0_13, %c0_14, %c0_15] : memref<1x32x128xbf16, #tpu.memory_space<vmem>>, vector<1x32x128xbf16>
    %17 = vector.shape_cast %16 : vector<1x32x128xbf16> to vector<32x128xbf16>
    %cst_16 = arith.constant dense<0.000000e+00> : vector<8x128xf32>
    %18 = tpu.matmul %13, %17, %cst_16 {dimension_numbers = #tpu.dot_dimension_numbers<[1], [0], [0], [1], [0, 0, 1, 1], [], []>} : vector<8x32xbf16>, vector<32x128xbf16>, vector<8x128xf32> -> vector<8x128xf32>
    %19 = arith.addf %15, %18 : vector<8x128xf32>
    %c0_17 = arith.constant 0 : index
    %c0_18 = arith.constant 0 : index
    %c0_19 = arith.constant 0 : index
    %20 = vector.load %arg7[%c0_17, %c0_18, %c0_19] : memref<1x1x128xf32, #tpu.memory_space<vmem>>, vector<1x1x128xf32>
    %21 = vector.shape_cast %20 : vector<1x1x128xf32> to vector<1x128xf32>
    %22 = vector.broadcast %21 : vector<1x128xf32> to vector<8x128xf32>
    %23 = arith.addf %19, %22 : vector<8x128xf32>
    %c0_20 = arith.constant 0 : index
    %c0_21 = arith.constant 0 : index
    %24 = vector.load %arg8[%c0_20, %c0_21] : memref<8x128xf32, #tpu.memory_space<vmem>>, vector<8x128xf32>
    tpu.vector_store %arg8[%c0_20, %c0_21], %23 {strides = array<i32>} : memref<8x128xf32, #tpu.memory_space<vmem>>, vector<8x128xf32>,
    return
  }
  func.func @transform_0(%arg0: i32) -> (i32, i32) {
    %c0_i32 = arith.constant 0 : i32
    %c0_i32_0 = arith.constant 0 : i32
    return %arg0, %c0_i32 : i32, i32
  }
  func.func @transform_1(%arg0: i32) -> (i32, i32) {
    %c0_i32 = arith.constant 0 : i32
    %c0_i32_0 = arith.constant 0 : i32
    %c0_i32_1 = arith.constant 0 : i32
    return %c0_i32, %c0_i32_0 : i32, i32
  }
  func.func @transform_2(%arg0: i32) -> (i32, i32, i32) {
    %c0_i32 = arith.constant 0 : i32
    %c0_i32_0 = arith.constant 0 : i32
    %c0_i32_1 = arith.constant 0 : i32
    return %arg0, %c0_i32, %c0_i32_0 : i32, i32, i32
  }
  func.func @transform_3(%arg0: i32) -> (i32, i32, i32) {
    %c0_i32 = arith.constant 0 : i32
    %c0_i32_0 = arith.constant 0 : i32
    %c0_i32_1 = arith.constant 0 : i32
    return %arg0, %c0_i32, %c0_i32_0 : i32, i32, i32
  }
  func.func @transform_4(%arg0: i32) -> (i32, i32) {
    %c0_i32 = arith.constant 0 : i32
    %c0_i32_0 = arith.constant 0 : i32
    %c0_i32_1 = arith.constant 0 : i32
    return %c0_i32, %c0_i32_0 : i32, i32
  }
  func.func @transform_5(%arg0: i32) -> (i32, i32, i32) {
    %c0_i32 = arith.constant 0 : i32
    %c0_i32_0 = arith.constant 0 : i32
    %c0_i32_1 = arith.constant 0 : i32
    return %arg0, %c0_i32, %c0_i32_0 : i32, i32, i32
  }
  func.func @transform_6(%arg0: i32) -> (i32, i32, i32) {
    %c0_i32 = arith.constant 0 : i32
    %c0_i32_0 = arith.constant 0 : i32
    %c0_i32_1 = arith.constant 0 : i32
    return %arg0, %c0_i32, %c0_i32_0 : i32, i32, i32
  }
  func.func @transform_7(%arg0: i32) -> (i32, i32) {
    %c0_i32 = arith.constant 0 : i32
    %c0_i32_0 = arith.constant 0 : i32
    return %arg0, %c0_i32 : i32, i32
  }
}

module attributes {stable_mosaic.version = 11 : i64} {
  func.func @_rep_mlp2l_kernel(%arg0: i32, %arg1: memref<8x16xf32, #tpu.memory_space<vmem>>, %arg2: memref<16x32xbf16, #tpu.memory_space<vmem>>, %arg3: memref<1x16x32xbf16, #tpu.memory_space<vmem>>, %arg4: memref<1x1x32xf32, #tpu.memory_space<vmem>>, %arg5: memref<32x128xbf16, #tpu.memory_space<vmem>>, %arg6: memref<1x32x128xbf16, #tpu.memory_space<vmem>>, %arg7: memref<1x1x128xf32, #tpu.memory_space<vmem>>, %arg8: memref<8x128xf32, #tpu.memory_space<vmem>>) attributes {dimension_semantics = [#tpu.dimension_semantics<parallel>], iteration_bounds = array<i64: 2>, scalar_prefetch = 0 : i64, scratch_operands = 0 : i64, tpu.core_type = #tpu.core_type<tc>, window_params = [{transform_indices = @transform_0, window_bounds = array<i64: 8, 16>}, {pipeline_mode = #tpu.pipeline_mode<synchronous>, transform_indices = @transform_1, window_bounds = array<i64: 16, 32>}, {transform_indices = @transform_2, window_bounds = array<i64: 1, 16, 32>}, {transform_indices = @transform_3, window_bounds = array<i64: 1, 1, 32>}, {pipeline_mode = #tpu.pipeline_mode<synchronous>, transform_indices = @transform_4, window_bounds = array<i64: 32, 128>}, {transform_indices = @transform_5, window_bounds = array<i64: 1, 32, 128>}, {transform_indices = @transform_6, window_bounds = array<i64: 1, 1, 128>}, {transform_indices = @transform_7, window_bounds = array<i64: 8, 128>}]} {
    %c0 = arith.constant 0 : index
    %c0_0 = arith.constant 0 : index
    %0 = vector.load %arg1[%c0, %c0_0] : memref<8x16xf32, #tpu.memory_space<vmem>>, vector<8x16xf32>
    %1 = arith.truncf %0 : vector<8x16xf32> to vector<8x16xbf16>
    %c0_1 = arith.constant 0 : index
    %c0_2 = arith.constant 0 : index
    %2 = vector.load %arg2[%c0_1, %c0_2] : memref<16x32xbf16, #tpu.memory_space<vmem>>, vector<16x32xbf16>
    %cst = arith.constant dense<0.000000e+00> : vector<8x32xf32>
    %3 = tpu.matmul %1, %2, %cst {dimension_numbers = #tpu.dot_dimension_numbers<[1], [0], [0], [1], [0, 0, 1, 1], [], []>} : vector<8x16xbf16>, vector<16x32xbf16>, vector<8x32xf32> -> vector<8x32xf32>
    %c0_3 = arith.constant 0 : index
    %c0_4 = arith.constant 0 : index
    %c0_5 = arith.constant 0 : index
    %4 = vector.load %arg3[%c0_3, %c0_4, %c0_5] : memref<1x16x32xbf16, #tpu.memory_space<vmem>>, vector<1x16x32xbf16>
    %5 = vector.shape_cast %4 : vector<1x16x32xbf16> to vector<16x32xbf16>
    %cst_6 = arith.constant dense<0.000000e+00> : vector<8x32xf32>
    %6 = tpu.matmul %1, %5, %cst_6 {dimension_numbers = #tpu.dot_dimension_numbers<[1], [0], [0], [1], [0, 0, 1, 1], [], []>} : vector<8x16xbf16>, vector<16x32xbf16>, vector<8x32xf32> -> vector<8x32xf32>
    %7 = arith.addf %3, %6 : vector<8x32xf32>
    %c0_7 = arith.constant 0 : index
    %c0_8 = arith.constant 0 : index
    %c0_9 = arith.constant 0 : index
    %8 = vector.load %arg4[%c0_7, %c0_8, %c0_9] : memref<1x1x32xf32, #tpu.memory_space<vmem>>, vector<1x1x32xf32>
    %9 = vector.shape_cast %8 : vector<1x1x32xf32> to vector<1x32xf32>
    %10 = vector.broadcast %9 : vector<1x32xf32> to vector<8x32xf32>
    %11 = arith.addf %7, %10 : vector<8x32xf32>
    %12 = math.tanh %11 : vector<8x32xf32>
    %13 = arith.truncf %12 : vector<8x32xf32> to vector<8x32xbf16>
    %c0_10 = arith.constant 0 : index
    %c0_11 = arith.constant 0 : index
    %14 = vector.load %arg5[%c0_10, %c0_11] : memref<32x128xbf16, #tpu.memory_space<vmem>>, vector<32x128xbf16>
    %cst_12 = arith.constant dense<0.000000e+00> : vector<8x128xf32>
    %15 = tpu.matmul %13, %14, %cst_12 {dimension_numbers = #tpu.dot_dimension_numbers<[1], [0], [0], [1], [0, 0, 1, 1], [], []>} : vector<8x32xbf16>, vector<32x128xbf16>, vector<8x128xf32> -> vector<8x128xf32>
    %c0_13 = arith.constant 0 : index
    %c0_14 = arith.constant 0 : index
    %c0_15 = arith.constant 0 : index
    %16 = vector.load %arg6[%c0_13, %c0_14, %c0_15] : memref<1x32x128xbf16, #tpu.memory_space<vmem>>, vector<1x32x128xbf16>
    %17 = vector.shape_cast %16 : vector<1x32x128xbf16> to vector<32x128xbf16>
    %cst_16 = arith.constant dense<0.000000e+00> : vector<8x128xf32>
    %18 = tpu.matmul %13, %17, %cst_16 {dimension_numbers = #tpu.dot_dimension_numbers<[1], [0], [0], [1], [0, 0, 1, 1], [], []>} : vector<8x32xbf16>, vector<32x128xbf16>, vector<8x128xf32> -> vector<8x128xf32>
    %19 = arith.addf %15, %18 : vector<8x128xf32>
    %c0_17 = arith.constant 0 : index
    %c0_18 = arith.constant 0 : index
    %c0_19 = arith.constant 0 : index
    %20 = vector.load %arg7[%c0_17, %c0_18, %c0_19] : memref<1x1x128xf32, #tpu.memory_space<vmem>>, vector<1x1x128xf32>
    %21 = vector.shape_cast %20 : vector<1x1x128xf32> to vector<1x128xf32>
    %22 = vector.broadcast %21 : vector<1x128xf32> to vector<8x128xf32>
    %23 = arith.addf %19, %22 : vector<8x128xf32>
    %c0_20 = arith.constant 0 : index
    %c0_21 = arith.constant 0 : index
    %24 = vector.load %arg8[%c0_20, %c0_21] : memref<8x128xf32, #tpu.memory_space<vmem>>, vector<8x128xf32>
    tpu.vector_store %arg8[%c0_20, %c0_21], %23 {strides = array<i32>} : memref<8x128xf32, #tpu.memory_space<vmem>>, vector<8x128xf32>,
    return
  }
  func.func @transform_0(%arg0: i32) -> (i32, i32) {
    %c0_i32 = arith.constant 0 : i32
    %c0_i32_0 = arith.constant 0 : i32
    return %arg0, %c0_i32 : i32, i32
  }
  func.func @transform_1(%arg0: i32) -> (i32, i32) {
    %c0_i32 = arith.constant 0 : i32
    %c0_i32_0 = arith.constant 0 : i32
    %c0_i32_1 = arith.constant 0 : i32
    return %c0_i32, %c0_i32_0 : i32, i32
  }
  func.func @transform_2(%arg0: i32) -> (i32, i32, i32) {
    %c0_i32 = arith.constant 0 : i32
    %c0_i32_0 = arith.constant 0 : i32
    %c0_i32_1 = arith.constant 0 : i32
    return %arg0, %c0_i32, %c0_i32_0 : i32, i32, i32
  }
  func.func @transform_3(%arg0: i32) -> (i32, i32, i32) {
    %c0_i32 = arith.constant 0 : i32
    %c0_i32_0 = arith.constant 0 : i32
    %c0_i32_1 = arith.constant 0 : i32
    return %arg0, %c0_i32, %c0_i32_0 : i32, i32, i32
  }
  func.func @transform_4(%arg0: i32) -> (i32, i32) {
    %c0_i32 = arith.constant 0 : i32
    %c0_i32_0 = arith.constant 0 : i32
    %c0_i32_1 = arith.constant 0 : i32
    return %c0_i32, %c0_i32_0 : i32, i32
  }
  func.func @transform_5(%arg0: i32) -> (i32, i32, i32) {
    %c0_i32 = arith.constant 0 : i32
    %c0_i32_0 = arith.constant 0 : i32
    %c0_i32_1 = arith.constant 0 : i32
    return %arg0, %c0_i32, %c0_i32_0 : i32, i32, i32
  }
  func.func @transform_6(%arg0: i32) -> (i32, i32, i32) {
    %c0_i32 = arith.constant 0 : i32
    %c0_i32_0 = arith.constant 0 : i32
    %c0_i32_1 = arith.constant 0 : i32
    return %arg0, %c0_i32, %c0_i32_0 : i32, i32, i32
  }
  func.func @transform_7(%arg0: i32) -> (i32, i32) {
    %c0_i32 = arith.constant 0 : i32
    %c0_i32_0 = arith.constant 0 : i32
    return %arg0, %c0_i32 : i32, i32
  }
}

</mosaic_0001>

<bundles_post_ra>
// kernel: tpu_custom_call.1
= control target key start
LH: loop header
LB: loop body
LE: loop exit
PB: predicated region body
PF: predicated region fallthrough
CT: control target
= control target key end

     0   :  { %s1563_s0 = inlined_call_operand.hbm [shape: f32[16,16], index: 0, kind: input, shape index: {}]   ;;  %s1564_s1 = inlined_call_operand.hbm [shape: bf16[16,32], index: 1, kind: input, shape index: {}]   ;;  %s1565_s2 = inlined_call_operand.hbm [shape: bf16[2,16,32], index: 2, kind: input, shape index: {}]   ;;  %s1566_s3 = inlined_call_operand.vmem [shape: f32[2,1,32], index: 3, kind: input, shape index: {}]   ;;  %s1567_s4 = inlined_call_operand.hbm [shape: bf16[32,128], index: 4, kind: input, shape index: {}]   ;;  %s1568_s5 = inlined_call_operand.hbm [shape: bf16[2,32,128], index: 5, kind: input, shape index: {}]   ;;  %s1569_s6 = inlined_call_operand.vmem [shape: f32[2,1,128], index: 6, kind: input, shape index: {}]   ;;  %s1570_s7 = inlined_call_operand.hbm [shape: f32[16,128], index: 7, kind: output, shape index: {}]  }
   0x1   :  { %1586 = sst [smem:[#allocation22_spill]] %s1564_s1 }
   0x2   :  { %12 = vsyncpa [#allocation3], 0 }
   0x3   :  { %14 = vsyncpa [#allocation3 + $0x1], 0 }
   0x4   :  { %15 = vsyncpa [#allocation6], 0 }
   0x5   :  { %16 = vsyncpa [#allocation10], 0 }
   0x6   :  { %18 = vsyncpa [#allocation10 + $0x1], 0 }
   0x7   :  { %19 = vsyncpa [#allocation4], 0 }
   0x8   :  { %21 = vsyncpa [#allocation4 + $0x1], 0  ;;  %s1263_s24 = smov 0   ;;  %s1265_s25 = smov 0  }
   0x9   :  { %s1267_s26 = smov 0   ;;  %s1269_s27 = smov 0  }
   0xa LB: > { %1587 = sst [smem:[#allocation18_spill]] %s1207_s26  ;;  %s1284_s28 = sadd.s32 4294967295, %s1211_s27   ;;  %s1211_s27 = sphi %s1269_s27, %s1614_s27   ;;  %s1207_s26 = sphi %s1267_s26, %s1616_s26   ;;  %s1203_s25 = sphi %s1265_s25, %s1618_s25   ;;  %s1199_s24 = sphi %s1263_s24, %s1617_s24  }
   0xb   : > { %s830_s29 = sadd.s32 4294967294, %s1211_s27   ;;  %p47_p0 = scmp.ne.s32.totalorder %s1203_s25, %s1199_s24 }
   0xc   : > { %p1579_p1 = scmp.eq.s32.totalorder %s1284_s28, 0  ;;  %p217_p2 = scmp.eq.s32.totalorder %s1284_s28, 1 }
   0xd   : > { %p223_p3 = scmp.eq.s32.totalorder %s830_s29, 1  ;;  %p831_p5 = scmp.ge.s32.totalorder %s1211_s27, 1 }
   0xe   : > { %p1293_p4 = por %p1579_p1, %p47_p0  ;;  %p230_p7 = scmp.lt.s32.totalorder %s1211_s27, 3 }
   0xf   : > { %p1298_p6 = por %p223_p3, %p47_p0  ;;  %s1213_s10 = smov [#allocation5]  }
  0x10   : > { %s1588_s30 = scalar_select %p1293_p4, 1, 0 }
  0x11   : > { %s1589_s8 = scalar_select %p1298_p6, 1, 0 }
  0x12   : > { %p1303_p8 = pnand %p831_p5, %p230_p7  ;;  %s242_s11 = sshll.u32 %s1213_s10, 4  ;;  %s243_s11 = int_to_ptr.vmem [resolvable:$true] %s242_s11 }
  0x13   : > { %1590 = sst [smem:[#allocation19_spill]] %s1589_s8  ;;  %s1317_s13 = sadd.s32 1, %s1211_s27  }
  0x14   : > { %s1591_s9 = scalar_select %p1303_p8, 1, 0 }
  0x15   : > { %p922_p9 = pneg %p1303_p8  ;;  %1593 = sst [smem:[#allocation20_spill]] %s1317_s13 }
  0x16   : > { %s34_s14 = sadd.s32 1, %s1207_s26  ;;  %s31_s15 = ssub.s32 %s1211_s27, %s1317_s13 }
  0x17   : > { %p1312_p11 = pnand %p922_p9, %p1579_p1  ;;  %s1006_s16 = scalar_lea.vmem %s243_s11, 128 }
  0x18   : > { %p1007_p13 = scmp.ne.s32.totalorder %s243_s11, %s1006_s16  ;;  %p1014_p5 = scmp.lt.s32.totalorder %s243_s11, %s243_s11 }
  0x19   : > { %s1592_s12 = scalar_select %p1312_p11, 1, 0 }
  0x1a   : > { %p1580_p12 = pneg %p1312_p11  ;;  %p1015_p7 = scmp.lt.s32.totalorder %s1006_s16, %s1006_s16 }
  0x1c   : > { %p1009_p0 = pnand %p1007_p13, %p1580_p12  ;;  %p1016_p9 = por %p1015_p7, %p1014_p5 }
  0x1e   : > { %p1010_p3 = pneg %p1009_p0 }
  0x20   : > { %p1017_p10 = pnand %p1016_p9, %p1010_p3 }
  0x22   : > { %1020 = shalt.err (!%p1017_p10)
}
  0x23   : > { %s1571_s17 = smov 64   ;;  %s1573_s18 = smov 4  }
  0x24   : > { %s1594_s1 = sld [smem:[#allocation22_spill]]  ;;  %p32_p10 = scmp.eq.s32.totalorder %s31_s15, 0 }
  0x25   : > { %p41_p13 = scmp.ne.s32.totalorder %s1207_s26, %s1203_s25  ;;  %p42_p0 = scmp.eq.s32.totalorder %s1211_s27, 0 }
  0x26   : > { %p945_p3 = scmp.lt.s32.totalorder %s1211_s27, 2  ;;  %s269_s23 = sand.u32 1, %s1211_s27  }
  0x27   : > { %s1340_s21 = scalar_select %p32_p10, %s1207_s26, %s34_s14  }
  0x28   : > { %p43_p5 = por %p42_p0, %p41_p13  ;;  %p1344_p7 = por %p217_p2, %p41_p13 }
  0x29   : > { %1595 = sst [smem:[#allocation21_spill]] %s1340_s21  ;;  %s1350_s29 = sand.u32 1, %s1207_s26  }
  0x2a   : > { %925 = dma.hbm_to_vmem [thread:$0]  (!%p1312_p11), %s1594_s1, 128, %s243_s11, [#allocation6], %s1571_s17, %s1571_s17, %s1573_s18  }
  0x2b   : > { %s1596_s22 = scalar_select %p1344_p7, 1, 0 }
  0x2c   : > { %s835_s10 = sshll.u32 %s1350_s29, 3  ;;  %s836_s16 = sshll.u32 %s1211_s27, 7 }
  0x2d   : > { %s1357_s15 = scalar_lea.hbm %s1563_s0, %s836_s16  ;;  %s273_s14 = scalar_lea.vmem [#allocation2], %s835_s10 }
  0x2e   : > { %s280_s20 = sshll.u32 %s273_s14, 4  ;;  %p1361_p2 = pnand %p945_p3, %p43_p5  ;;  %s1359_s20 = int_to_ptr.vmem [resolvable:$true] %s280_s20 }
  0x2f   : > { %s1368_s21 = scalar_lea.hbm %s1565_s2, %s836_s16  ;;  %s1370_s19 = scalar_lea.vmem [#allocation7], %s835_s10 }
  0x30   : > { %s298_s11 = sshll.u32 %s1370_s19, 4  ;;  %s1373_s26 = scalar_lea.sflag [#allocation3], %s269_s23  ;;  %s1402_s11 = int_to_ptr.vmem [resolvable:$true] %s298_s11 }
  0x31   : > { %s1021_s13 = scalar_lea.hbm %s1357_s15, 128  ;;  %p1379_p10 = pneg %p1361_p2 }
  0x32   : > { %p1022_p9 = scmp.ne.s32.totalorder %s1357_s15, %s1021_s13  ;;  %s1026_s10 = scalar_lea.hbm %s1563_s0, 256 }
  0x33   : > { %p1027_p3 = scmp.lt.s32.totalorder %s1357_s15, %s1563_s0  ;;  %p1028_p5 = scmp.lt.s32.totalorder %s1026_s10, %s1021_s13 }
  0x34   : > { %p1024_p13 = pnand %p1379_p10, %p1022_p9 }
  0x35   : > { %p1029_p1 = por %p1028_p5, %p1027_p3 }
  0x36   : > { %p1025_p0 = pneg %p1024_p13 }
  0x38   : > { %p1030_p12 = pnand %p1029_p1, %p1025_p0 }
  0x3a   : > { %1033 = shalt.err (!%p1030_p12)
}
  0x3b   : > { %s1034_s23 = scalar_lea.vmem %s1359_s20, 128  ;;  %s1216_s19 = smov [#allocation2]  }
  0x3c   : > { %p1035_p6 = scmp.ne.s32.totalorder %s1359_s20, %s1034_s23  ;;  %s1039_s1 = sshll.u32 %s1216_s19, 4  ;;  %s1040_s1 = int_to_ptr.vmem [resolvable:$false] %s1039_s1 }
  0x3d   : > { %s1041_s18 = scalar_lea.vmem %s1040_s1, 256  ;;  %p1042_p7 = scmp.lt.s32.totalorder %s1359_s20, %s1040_s1 }
  0x3e   : > { %p1037_p9 = pnand %p1035_p6, %p1379_p10  ;;  %p1043_p4 = scmp.lt.s32.totalorder %s1041_s18, %s1034_s23 }
  0x40   : > { %p1038_p13 = pneg %p1037_p9  ;;  %p1044_p8 = por %p1043_p4, %p1042_p7 }
  0x42   : > { %p1045_p11 = pnand %p1044_p8, %p1038_p13 }
  0x44   : > { %1048 = shalt.err (!%p1045_p11)
}
  0x45   : > { %932 = dma.hbm_to_vmem [thread:$0]  (!%p1361_p2), %s1357_s15, 128, %s1359_s20, %s1373_s26  }
  0x46   : > { %s1217_s8 = smov [#allocation8]   ;;  %p1599_p6 = scmp.ne.s32.totalorder %s1592_s12, 0 }
  0x47   : > { %s255_s13 = sshll.u32 %s1217_s8, 4  ;;  %s256_s13 = int_to_ptr.vmem [resolvable:$true] %s255_s13 }
  0x48   : > { %s1060_s16 = scalar_lea.vmem %s256_s13, 256  ;;  %p1600_p4 = pneg %p1599_p6 }
  0x49   : > { %p1061_p1 = scmp.ne.s32.totalorder %s256_s13, %s1060_s16  ;;  %p1068_p12 = scmp.lt.s32.totalorder %s256_s13, %s256_s13 }
  0x4a   : > { %p1069_p7 = scmp.lt.s32.totalorder %s1060_s16, %s1060_s16 }
  0x4b   : > { %p1063_p8 = pnand %p1061_p1, %p1600_p4 }
  0x4c   : > { %p1070_p0 = por %p1069_p7, %p1068_p12 }
  0x4d   : > { %p1064_p11 = pneg %p1063_p8 }
  0x4f   : > { %p1071_p3 = pnand %p1070_p0, %p1064_p11 }
  0x51   : > { %1074 = shalt.err (!%p1071_p3)
}
  0x52   : > { %s1601_s15 = smov 4   ;;  %s1602_s20 = smov 64  }
  0x53   : > { %928 = dma.hbm_to_vmem [thread:$0]  (!%p1599_p6), %s1567_s4, 256, %s256_s13, [#allocation6], %s1602_s20, %s1602_s20, %s1601_s15  }
  0x54   : > { %s1075_s1 = scalar_lea.hbm %s1368_s21, 128  ;;  %s1080_s12 = scalar_lea.hbm %s1565_s2, 256 }
  0x55   : > { %p1076_p5 = scmp.ne.s32.totalorder %s1368_s21, %s1075_s1  ;;  %p1081_p1 = scmp.lt.s32.totalorder %s1368_s21, %s1565_s2 }
  0x56   : > { %p1082_p4 = scmp.lt.s32.totalorder %s1080_s12, %s1075_s1 }
  0x57   : > { %p1078_p9 = pnand %p1076_p5, %p1379_p10 }
  0x58   : > { %p1083_p8 = por %p1082_p4, %p1081_p1 }
  0x59   : > { %p1079_p13 = pneg %p1078_p9 }
  0x5b   : > { %p1084_p11 = pnand %p1083_p8, %p1079_p13 }
  0x5d   : > { %1087 = shalt.err (!%p1084_p11)
}
  0x5e   : > { %s1088_s13 = scalar_lea.vmem %s1402_s11, 128  ;;  %s1218_s23 = smov [#allocation7]  }
  0x5f   : > { %p1089_p6 = scmp.ne.s32.totalorder %s1402_s11, %s1088_s13  ;;  %s1093_s19 = sshll.u32 %s1218_s23, 4  ;;  %s1094_s19 = int_to_ptr.vmem [resolvable:$false] %s1093_s19 }
  0x60   : > { %s1095_s18 = scalar_lea.vmem %s1094_s19, 256  ;;  %p1096_p0 = scmp.lt.s32.totalorder %s1402_s11, %s1094_s19 }
  0x61   : > { %p1091_p12 = pnand %p1089_p6, %p1379_p10  ;;  %p1097_p3 = scmp.lt.s32.totalorder %s1095_s18, %s1088_s13 }
  0x63   : > { %p1092_p7 = pneg %p1091_p12  ;;  %p1098_p5 = por %p1097_p3, %p1096_p0 }
  0x65   : > { %p1099_p9 = pnand %p1098_p5, %p1092_p7 }
  0x67   : > { %1102 = shalt.err (!%p1099_p9)
}
  0x68   : > { %935 = dma.hbm_to_vmem [thread:$0]  (!%p1361_p2), %s1368_s21, 128, %s1402_s11, %s1373_s26, %s1602_s20, %s1602_s20, %s1601_s15  }
  0x69   : > { %s867_s10 = sshll.u32 %s1211_s27, 8  ;;  %s1603_s16 = sshll.u32 %s1350_s29, 4 }
  0x6a   : > { %s1444_s12 = scalar_lea.hbm %s1568_s5, %s867_s10  ;;  %s318_s13 = scalar_lea.vmem [#allocation9], %s1603_s16 }
  0x6b   : > { %s325_s23 = sshll.u32 %s318_s13, 4  ;;  %s315_s19 = scalar_lea.sflag [#allocation10], %s1350_s29  ;;  %s1448_s23 = int_to_ptr.vmem [resolvable:$true] %s325_s23 }
  0x6c   : > { %s1103_s18 = scalar_lea.hbm %s1444_s12, 256  ;;  %s1108_s11 = scalar_lea.hbm %s1568_s5, 512 }
  0x6d   : > { %p1104_p13 = scmp.ne.s32.totalorder %s1444_s12, %s1103_s18  ;;  %p1109_p8 = scmp.lt.s32.totalorder %s1444_s12, %s1568_s5 }
  0x6e   : > { %p1110_p11 = scmp.lt.s32.totalorder %s1108_s11, %s1103_s18 }
  0x6f   : > { %p1106_p1 = pnand %p1104_p13, %p1379_p10 }
  0x70   : > { %p1111_p6 = por %p1110_p11, %p1109_p8 }
  0x71   : > { %p1107_p4 = pneg %p1106_p1 }
  0x73   : > { %p1112_p12 = pnand %p1111_p6, %p1107_p4 }
  0x75   : > { %1115 = shalt.err (!%p1112_p12)
}
  0x76   : > { %s1116_s29 = scalar_lea.vmem %s1448_s23, 256  ;;  %s1219_s8 = smov [#allocation9]  }
  0x77   : > { %p1117_p7 = scmp.ne.s32.totalorder %s1448_s23, %s1116_s29  ;;  %s1121_s16 = sshll.u32 %s1219_s8, 4  ;;  %s1122_s16 = int_to_ptr.vmem [resolvable:$false] %s1121_s16 }
  0x78   : > { %s1123_s13 = scalar_lea.vmem %s1122_s16, 512  ;;  %p1124_p5 = scmp.lt.s32.totalorder %s1448_s23, %s1122_s16 }
  0x79   : > { %p1119_p0 = pnand %p1117_p7, %p1379_p10  ;;  %p1125_p9 = scmp.lt.s32.totalorder %s1123_s13, %s1116_s29 }
  0x7b   : > { %p1120_p3 = pneg %p1119_p0  ;;  %p1126_p13 = por %p1125_p9, %p1124_p5 }
  0x7d   : > { %p1127_p1 = pnand %p1126_p13, %p1120_p3 }
  0x7f   : > { %1130 = shalt.err (!%p1127_p1)
}
  0x80   : > { %938 = dma.hbm_to_vmem [thread:$0]  (!%p1361_p2), %s1444_s12, 256, %s1448_s23, %s315_s19, %s1602_s20, %s1602_s20, %s1601_s15  }
  0x81   : > { %p1604_p10 = scmp.ne.s32.totalorder %s1591_s9, 0 }
  0x82   : > { %s345_s14 = sand.u32 (!%p1604_p10), 1, %s1284_s28   ;;  %s1478_s18 = sand.u32 (!%p1604_p10), 1, %s1203_s25  }
  0x83   : > { %343 = sbr.rel (%p1604_p10) target bundleno = 579 (0x243), region = 48  ;;  %s1481_s26 = sshll.u32 (!%p1604_p10), %s1478_s18, 3 }
  0x84   : > { %s346_s17 = scalar_lea.sflag (!%p1604_p10), [#allocation3], %s345_s14  ;;  %s349_s21 = scalar_lea.vmem (!%p1604_p10), [#allocation2], %s1481_s26 }
  0x85   : > { %p1605_p4 = scmp.ne.s32.totalorder (!%p1604_p10), %s1588_s30, 0 }
  0x88   : > { %1174 = dma.done.wait (%p1605_p4), %s346_s17, 128  }
  0x89   : > { %1176 = vsyncadd (%p1605_p4), %s346_s17, 4294967168  ;;  %p1606_p2 = scmp.eq.s32.totalorder %s1284_s28, 0 }
  0x8b   : > { %1178 = dma.done.wait (%p1606_p2), [#allocation6], 128   ;;  %p1607_p8 = pmov %p1606_p2 }
  0x8c   : > { %s362_s9 = scalar_lea.vmem [#allocation7], %s1481_s26 }
  0x8d   : > { %1180 = vsyncadd (%p1607_p8), [#allocation6], 4294967168 }
  0x8e   : > { %1182 = dma.done.wait (%p1605_p4), %s346_s17, 128  }
  0x8f   : > { %1184 = vsyncadd (%p1605_p4), %s346_s17, 4294967168  ;;  %p1608_p11 = pmov %p1606_p2 }
  0x90   : > { %p1609_p6 = pmov %p1606_p2 }
  0x91   : > { %1186 = dma.done.wait (%p1608_p11), [#allocation6], 256  }
  0x92   : > { %1188 = vsyncadd (%p1609_p6), [#allocation6], 4294967040  ;;  %s848_s15 = sshll.u32 %s1478_s18, 4  ;;  %s372_s20 = scalar_lea.sflag [#allocation10], %s1478_s18 }
  0x93   : > { %s375_s12 = scalar_lea.vmem [#allocation9], %s848_s15 }
  0x94   : > { %1190 = dma.done.wait (%p1605_p4), %s372_s20, 256  }
  0x95   : > { %1192 = vsyncadd (%p1605_p4), %s372_s20, 4294967040  ;;  %v1220_v0 = vmov 0.0   ;;  %vm1221_vm0 = vmmov 0   ;;  %v987_v1 = vld [vmem:[%s362_s9] sm:$0xff]   ;;  %v988_v2 = vld [vmem:[#allocation5] sm:$0xff]   ;;  %vm441_vm1 = vcmask 130048  }
  0x96   : > { %878 = vmatprep.subr.bf16.mxu0 %v1220_v0  ;;  %884 = vmatprep.subr.bf16.mxu1 %v1220_v0  ;;  %v429_v3 = vld [vmem:[%s349_s21] sm:$0xff]  ;;  %v990_v6 = vld [vmem:[#allocation8 + $0x8] sm:$0xff]   ;;  %p422_p12 = scmp.lt.s32.totalorder %s1284_s28, 1  ;;  %vm561_vm2 = vcmask 261120   ;;  %s863_s8 = sshll.u32 %s1284_s28, 7 }
  0x97   : > { %880 = vmatprep.mubr.msk.bf16.mxu0 %vm1221_vm0, %v1220_v0  ;;  %886 = vmatprep.mubr.msk.bf16.mxu1 %vm1221_vm0, %v1220_v0  ;;  %v430_v4 = vpack.c.bf16 %v429_v3, %v429_v3  ;;  %v989_v5 = vld [vmem:[%s375_s12 + $0x8] sm:$0xff]   ;;  %v991_v7 = vld [vmem:[%s375_s12] sm:$0xff]   ;;  %s421_s16 = scalar_lea.vmem [#allocation11], %s1481_s26  ;;  %s1520_s21 = scalar_lea.hbm %s1570_s7, %s863_s8 }
  0x98   : > { %879 = vmatpush3.bf16.msra.mxu0 %v987_v1  ;;  %885 = vmatpush3.bf16.msra.mxu1 %v988_v2  ;;  %v992_v8 = vld [vmem:[#allocation8] sm:$0xff]   ;;  %s423_s30 = scalar_select %p422_p12, %s1284_s28, 1 }
  0x99   : > { %890 = vmatprep.subr.bf16.mxu0 %v1220_v0  ;;  %898 = vmatprep.subr.bf16.mxu1 %v1220_v0  ;;  %s680_s13 = sshll.u32 %s421_s16, 4  ;;  %s667_s28 = scalar_lea.sflag [#allocation4], %s1478_s18  ;;  %s1522_s13 = int_to_ptr.vmem [resolvable:$true] %s680_s13 }
  0x9a   : > { %s424_s11 = scalar_lea.vmem %s1566_s3, %s423_s30  ;;  %s427_s29 = scalar_lea.vmem %s1569_s6, %s423_s30 }
  0x9b   : > { %881 = vmatmul.mubr.msk.bf16.vlgmr.msra.gmra.mxu0 %vm441_vm1, %v430_v4  ;;  %887 = vmatmul.mubr.msk.bf16.vlgmr.msra.gmra.mxu1 %vm441_vm1, %v430_v4  ;;  %v854_v11 = vld [vmem:[%s424_s11] ss:$0 sm:$0xff]  ;;  %s1131_s26 = scalar_lea.vmem %s1522_s13, 128  ;;  %p1610_p0 = scmp.ne.s32.totalorder %s1596_s22, 0 }
  0x9c   : > { %894 = vmatprep.mubr.msk.bf16.mxu0 %vm1221_vm0, %v1220_v0  ;;  %902 = vmatprep.mubr.msk.bf16.mxu1 %vm1221_vm0, %v1220_v0  ;;  %v861_v24 = vld [vmem:[%s427_s29] ss:$0 sm:$0xff]  ;;  %p1132_p7 = scmp.ne.s32.totalorder %s1522_s13, %s1131_s26  ;;  %s1222_s9 = smov [#allocation11]  }
  0x9d   : > { %891 = vmatpush3.bf16.msra.mxu0 %v989_v5  ;;  %899 = vmatpush3.bf16.msra.mxu1 %v990_v6  ;;  %s1135_s15 = sshll.u32 %s1222_s9, 4  ;;  %s1136_s15 = int_to_ptr.vmem [resolvable:$false] %s1135_s15 }
  0x9e   : > { %892 = vmatprep.subr.bf16.mxu0 %v1220_v0  ;;  %900 = vmatprep.subr.bf16.mxu1 %v1220_v0  ;;  %p1133_p3 = pnand %p1132_p7, %p1610_p0  ;;  %s1137_s20 = scalar_lea.vmem %s1136_s15, 256 }
  0x9f   : > { %p1138_p9 = scmp.lt.s32.totalorder %s1522_s13, %s1136_s15  ;;  %p1139_p13 = scmp.lt.s32.totalorder %s1137_s20, %s1131_s26 }
  0xa0   : > { %p1134_p5 = pneg %p1133_p3 }
  0xa1   : > { %893 = vmatpush3.bf16.msra.mxu0 %v991_v7  ;;  %901 = vmatpush3.bf16.msra.mxu1 %v992_v8  ;;  %p1140_p1 = por %p1139_p13, %p1138_p9 }
  0xa3   : > { %p1141_p10 = pnand %p1140_p1, %p1134_p5 }
 0x15b   : > { %v479_v9 = vpop.f32.mrf.mxu0  ;;  %v525_v10 = vpop.f32.mrf.mxu1 }
 0x15c   : > { %v526_v12 = vadd.f32 %v525_v10, %v479_v9 }
 0x15d   : > { %v882_v13 = vpop.f32.mrf.mxu0  ;;  %v888_v14 = vpop.f32.mrf.mxu1 }
 0x15e   : > { %v538_v15 = vadd.f32 %v854_v11, %v526_v12 }
 0x15f   : > { %v482_v16 = vpop.f32.mrf.mxu0  ;;  %v528_v17 = vpop.f32.mrf.mxu1 }
 0x160   : > { %993 = vtanh.f32 %v538_v15 }
 0x161   : > { %v883_v18 = vpop.f32.mrf.mxu0  ;;  %v889_v19 = vpop.f32.mrf.mxu1 }
 0x16d   : > { %v994_v20 = vpop.eup %993 }
 0x16e   : > { %v540_v21 = vpack.c.bf16 %v994_v20, %v994_v20 }
 0x170   : > { %895 = vmatmul.mubr.msk.bf16.vlgmr.msra.gmra.mxu0 %vm561_vm2, %v540_v21  ;;  %903 = vmatmul.mubr.msk.bf16.vlgmr.msra.gmra.mxu1 %vm561_vm2, %v540_v21 }
 0x230   : > { %v599_v22 = vpop.f32.mrf.mxu0  ;;  %v651_v23 = vpop.f32.mrf.mxu1 }
 0x231   : > { %v652_v25 = vadd.f32 %v651_v23, %v599_v22 }
 0x232   : > { %v896_v26 = vpop.f32.mrf.mxu0  ;;  %v904_v27 = vpop.f32.mrf.mxu1 }
 0x233   : > { %v664_v28 = vadd.f32 %v861_v24, %v652_v25 }
 0x234   : > { %v602_v29 = vpop.f32.mrf.mxu0  ;;  %v654_v30 = vpop.f32.mrf.mxu1 }
 0x235   : > { %665 = vst [vmem:[%s421_s16] sm:$0xff] %v664_v28 }
 0x236   : > { %v897_v31 = vpop.f32.mrf.mxu0  ;;  %v905_v32 = vpop.f32.mrf.mxu1 }
 0x237   : > { %1144 = shalt.err (!%p1141_p10)
}
 0x238   : > { %s1145_s12 = scalar_lea.hbm %s1520_s21, 128  ;;  %s1149_s23 = scalar_lea.hbm %s1570_s7, 256 }
 0x239   : > { %p1146_p4 = scmp.ne.s32.totalorder %s1520_s21, %s1145_s12  ;;  %p1150_p11 = scmp.lt.s32.totalorder %s1520_s21, %s1570_s7 }
 0x23a   : > { %p1151_p6 = scmp.lt.s32.totalorder %s1149_s23, %s1145_s12 }
 0x23b   : > { %p1147_p2 = pnand %p1146_p4, %p1610_p0 }
 0x23c   : > { %p1152_p12 = por %p1151_p6, %p1150_p11 }
 0x23d   : > { %p1148_p8 = pneg %p1147_p2 }
 0x23f   : > { %p1153_p7 = pnand %p1152_p12, %p1148_p8 }
 0x241   : > { %1156 = shalt.err (!%p1153_p7)
}
 0x242   : > { %920 = dma.vmem_to_hbm [thread:$0]  (%p1610_p0), %s1522_s13, 128, %s1520_s21, %s667_s28  }
 0x243 PF: > { %s1611_s10 = sld [smem:[#allocation19_spill]]  ;;  %s692_s1 = sand.u32 1, %s1199_s24  }
 0x244   : > { %p1613_p5 = scmp.ge.s32.totalorder %s1211_s27, 2  ;;  %s693_s29 = scalar_lea.sflag [#allocation4], %s692_s1 }
 0x249   : > { %p1612_p3 = scmp.ne.s32.totalorder %s1611_s10, 0 }
 0x24b   : > { %p940_p9 = pnand %p1613_p5, %p1612_p3 }
 0x24d   : > { %p941_p13 = pneg %p940_p9 }
 0x24f   : > { %1194 = dma.done.wait (%p941_p13), %s693_s29, 128  }
 0x250   : > { %1196 = vsyncadd (%p941_p13), %s693_s29, 4294967168  ;;  %s1614_s27 = sld [smem:[#allocation20_spill]]  ;;  %s1617_s24 = smov %s1203_s25 }
 0x251   : > { %s1615_s8 = sld [smem:[#allocation18_spill]] }
 0x252   : > { %s1616_s26 = sld [smem:[#allocation21_spill]] }
 0x256   : > { %p24_p1 = scmp.ge.s32.totalorder %s1614_s27, 4  }
 0x257   : > { %s1618_s25 = smov %s1615_s8 }
 0x258   :  { %26 = sbr.rel (!%p24_p1) target bundleno = 10 (0xa), region = 131 }
 0x25d   :  { %698 = vsyncpa [#allocation3], 1 }
 0x25e   :  { %700 = vsyncpa [#allocation3 + $0x1], 1 }
 0x25f   :  { %701 = vsyncpa [#allocation6], 1 }
 0x260   :  { %702 = vsyncpa [#allocation10], 1 }
 0x261   :  { %704 = vsyncpa [#allocation10 + $0x1], 1 }
 0x262   :  { %705 = vsyncpa [#allocation4], 1 }
 0x263   :  { %707 = vsyncpa [#allocation4 + $0x1], 1 }

// kernel: tpu_custom_call.1
= control target key start
LH: loop header
LB: loop body
LE: loop exit
PB: predicated region body
PF: predicated region fallthrough
CT: control target
= control target key end

     0   :  { %s1563_s0 = inlined_call_operand.hbm [shape: f32[16,16], index: 0, kind: input, shape index: {}]   ;;  %s1564_s1 = inlined_call_operand.hbm [shape: bf16[16,32], index: 1, kind: input, shape index: {}]   ;;  %s1565_s2 = inlined_call_operand.hbm [shape: bf16[2,16,32], index: 2, kind: input, shape index: {}]   ;;  %s1566_s3 = inlined_call_operand.vmem [shape: f32[2,1,32], index: 3, kind: input, shape index: {}]   ;;  %s1567_s4 = inlined_call_operand.hbm [shape: bf16[32,128], index: 4, kind: input, shape index: {}]   ;;  %s1568_s5 = inlined_call_operand.hbm [shape: bf16[2,32,128], index: 5, kind: input, shape index: {}]   ;;  %s1569_s6 = inlined_call_operand.vmem [shape: f32[2,1,128], index: 6, kind: input, shape index: {}]   ;;  %s1570_s7 = inlined_call_operand.hbm [shape: f32[16,128], index: 7, kind: output, shape index: {}]  }
   0x1   :  { %1586 = sst [smem:[#allocation22_spill]] %s1564_s1 }
   0x2   :  { %12 = vsyncpa [#allocation3], 0 }
   0x3   :  { %14 = vsyncpa [#allocation3 + $0x1], 0 }
   0x4   :  { %15 = vsyncpa [#allocation6], 0 }
   0x5   :  { %16 = vsyncpa [#allocation10], 0 }
   0x6   :  { %18 = vsyncpa [#allocation10 + $0x1], 0 }
   0x7   :  { %19 = vsyncpa [#allocation4], 0 }
   0x8   :  { %21 = vsyncpa [#allocation4 + $0x1], 0  ;;  %s1263_s24 = smov 0   ;;  %s1265_s25 = smov 0  }
   0x9   :  { %s1267_s26 = smov 0   ;;  %s1269_s27 = smov 0  }
   0xa LB: > { %1587 = sst [smem:[#allocation18_spill]] %s1207_s26  ;;  %s1284_s28 = sadd.s32 4294967295, %s1211_s27   ;;  %s1211_s27 = sphi %s1269_s27, %s1614_s27   ;;  %s1207_s26 = sphi %s1267_s26, %s1616_s26   ;;  %s1203_s25 = sphi %s1265_s25, %s1618_s25   ;;  %s1199_s24 = sphi %s1263_s24, %s1617_s24  }
   0xb   : > { %s830_s29 = sadd.s32 4294967294, %s1211_s27   ;;  %p47_p0 = scmp.ne.s32.totalorder %s1203_s25, %s1199_s24 }
   0xc   : > { %p1579_p1 = scmp.eq.s32.totalorder %s1284_s28, 0  ;;  %p217_p2 = scmp.eq.s32.totalorder %s1284_s28, 1 }
   0xd   : > { %p223_p3 = scmp.eq.s32.totalorder %s830_s29, 1  ;;  %p831_p5 = scmp.ge.s32.totalorder %s1211_s27, 1 }
   0xe   : > { %p1293_p4 = por %p1579_p1, %p47_p0  ;;  %p230_p7 = scmp.lt.s32.totalorder %s1211_s27, 3 }
   0xf   : > { %p1298_p6 = por %p223_p3, %p47_p0  ;;  %s1213_s10 = smov [#allocation5]  }
  0x10   : > { %s1588_s30 = scalar_select %p1293_p4, 1, 0 }
  0x11   : > { %s1589_s8 = scalar_select %p1298_p6, 1, 0 }
  0x12   : > { %p1303_p8 = pnand %p831_p5, %p230_p7  ;;  %s242_s11 = sshll.u32 %s1213_s10, 4  ;;  %s243_s11 = int_to_ptr.vmem [resolvable:$true] %s242_s11 }
  0x13   : > { %1590 = sst [smem:[#allocation19_spill]] %s1589_s8  ;;  %s1317_s13 = sadd.s32 1, %s1211_s27  }
  0x14   : > { %s1591_s9 = scalar_select %p1303_p8, 1, 0 }
  0x15   : > { %p922_p9 = pneg %p1303_p8  ;;  %1593 = sst [smem:[#allocation20_spill]] %s1317_s13 }
  0x16   : > { %s34_s14 = sadd.s32 1, %s1207_s26  ;;  %s31_s15 = ssub.s32 %s1211_s27, %s1317_s13 }
  0x17   : > { %p1312_p11 = pnand %p922_p9, %p1579_p1  ;;  %s1006_s16 = scalar_lea.vmem %s243_s11, 128 }
  0x18   : > { %p1007_p13 = scmp.ne.s32.totalorder %s243_s11, %s1006_s16  ;;  %p1014_p5 = scmp.lt.s32.totalorder %s243_s11, %s243_s11 }
  0x19   : > { %s1592_s12 = scalar_select %p1312_p11, 1, 0 }
  0x1a   : > { %p1580_p12 = pneg %p1312_p11  ;;  %p1015_p7 = scmp.lt.s32.totalorder %s1006_s16, %s1006_s16 }
  0x1c   : > { %p1009_p0 = pnand %p1007_p13, %p1580_p12  ;;  %p1016_p9 = por %p1015_p7, %p1014_p5 }
  0x1e   : > { %p1010_p3 = pneg %p1009_p0 }
  0x20   : > { %p1017_p10 = pnand %p1016_p9, %p1010_p3 }
  0x22   : > { %1020 = shalt.err (!%p1017_p10)
}
  0x23   : > { %s1571_s17 = smov 64   ;;  %s1573_s18 = smov 4  }
  0x24   : > { %s1594_s1 = sld [smem:[#allocation22_spill]]  ;;  %p32_p10 = scmp.eq.s32.totalorder %s31_s15, 0 }
  0x25   : > { %p41_p13 = scmp.ne.s32.totalorder %s1207_s26, %s1203_s25  ;;  %p42_p0 = scmp.eq.s32.totalorder %s1211_s27, 0 }
  0x26   : > { %p945_p3 = scmp.lt.s32.totalorder %s1211_s27, 2  ;;  %s269_s23 = sand.u32 1, %s1211_s27  }
  0x27   : > { %s1340_s21 = scalar_select %p32_p10, %s1207_s26, %s34_s14  }
  0x28   : > { %p43_p5 = por %p42_p0, %p41_p13  ;;  %p1344_p7 = por %p217_p2, %p41_p13 }
  0x29   : > { %1595 = sst [smem:[#allocation21_spill]] %s1340_s21  ;;  %s1350_s29 = sand.u32 1, %s1207_s26  }
  0x2a   : > { %925 = dma.hbm_to_vmem [thread:$0]  (!%p1312_p11), %s1594_s1, 128, %s243_s11, [#allocation6], %s1571_s17, %s1571_s17, %s1573_s18  }
  0x2b   : > { %s1596_s22 = scalar_select %p1344_p7, 1, 0 }
  0x2c   : > { %s835_s10 = sshll.u32 %s1350_s29, 3  ;;  %s836_s16 = sshll.u32 %s1211_s27, 7 }
  0x2d   : > { %s1357_s15 = scalar_lea.hbm %s1563_s0, %s836_s16  ;;  %s273_s14 = scalar_lea.vmem [#allocation2], %s835_s10 }
  0x2e   : > { %s280_s20 = sshll.u32 %s273_s14, 4  ;;  %p1361_p2 = pnand %p945_p3, %p43_p5  ;;  %s1359_s20 = int_to_ptr.vmem [resolvable:$true] %s280_s20 }
  0x2f   : > { %s1368_s21 = scalar_lea.hbm %s1565_s2, %s836_s16  ;;  %s1370_s19 = scalar_lea.vmem [#allocation7], %s835_s10 }
  0x30   : > { %s298_s11 = sshll.u32 %s1370_s19, 4  ;;  %s1373_s26 = scalar_lea.sflag [#allocation3], %s269_s23  ;;  %s1402_s11 = int_to_ptr.vmem [resolvable:$true] %s298_s11 }
  0x31   : > { %s1021_s13 = scalar_lea.hbm %s1357_s15, 128  ;;  %p1379_p10 = pneg %p1361_p2 }
  0x32   : > { %p1022_p9 = scmp.ne.s32.totalorder %s1357_s15, %s1021_s13  ;;  %s1026_s10 = scalar_lea.hbm %s1563_s0, 256 }
  0x33   : > { %p1027_p3 = scmp.lt.s32.totalorder %s1357_s15, %s1563_s0  ;;  %p1028_p5 = scmp.lt.s32.totalorder %s1026_s10, %s1021_s13 }
  0x34   : > { %p1024_p13 = pnand %p1379_p10, %p1022_p9 }
  0x35   : > { %p1029_p1 = por %p1028_p5, %p1027_p3 }
  0x36   : > { %p1025_p0 = pneg %p1024_p13 }
  0x38   : > { %p1030_p12 = pnand %p1029_p1, %p1025_p0 }
  0x3a   : > { %1033 = shalt.err (!%p1030_p12)
}
  0x3b   : > { %s1034_s23 = scalar_lea.vmem %s1359_s20, 128  ;;  %s1216_s19 = smov [#allocation2]  }
  0x3c   : > { %p1035_p6 = scmp.ne.s32.totalorder %s1359_s20, %s1034_s23  ;;  %s1039_s1 = sshll.u32 %s1216_s19, 4  ;;  %s1040_s1 = int_to_ptr.vmem [resolvable:$false] %s1039_s1 }
  0x3d   : > { %s1041_s18 = scalar_lea.vmem %s1040_s1, 256  ;;  %p1042_p7 = scmp.lt.s32.totalorder %s1359_s20, %s1040_s1 }
  0x3e   : > { %p1037_p9 = pnand %p1035_p6, %p1379_p10  ;;  %p1043_p4 = scmp.lt.s32.totalorder %s1041_s18, %s1034_s23 }
  0x40   : > { %p1038_p13 = pneg %p1037_p9  ;;  %p1044_p8 = por %p1043_p4, %p1042_p7 }
  0x42   : > { %p1045_p11 = pnand %p1044_p8, %p1038_p13 }
  0x44   : > { %1048 = shalt.err (!%p1045_p11)
}
  0x45   : > { %932 = dma.hbm_to_vmem [thread:$0]  (!%p1361_p2), %s1357_s15, 128, %s1359_s20, %s1373_s26  }
  0x46   : > { %s1217_s8 = smov [#allocation8]   ;;  %p1599_p6 = scmp.ne.s32.totalorder %s1592_s12, 0 }
  0x47   : > { %s255_s13 = sshll.u32 %s1217_s8, 4  ;;  %s256_s13 = int_to_ptr.vmem [resolvable:$true] %s255_s13 }
  0x48   : > { %s1060_s16 = scalar_lea.vmem %s256_s13, 256  ;;  %p1600_p4 = pneg %p1599_p6 }
  0x49   : > { %p1061_p1 = scmp.ne.s32.totalorder %s256_s13, %s1060_s16  ;;  %p1068_p12 = scmp.lt.s32.totalorder %s256_s13, %s256_s13 }
  0x4a   : > { %p1069_p7 = scmp.lt.s32.totalorder %s1060_s16, %s1060_s16 }
  0x4b   : > { %p1063_p8 = pnand %p1061_p1, %p1600_p4 }
  0x4c   : > { %p1070_p0 = por %p1069_p7, %p1068_p12 }
  0x4d   : > { %p1064_p11 = pneg %p1063_p8 }
  0x4f   : > { %p1071_p3 = pnand %p1070_p0, %p1064_p11 }
  0x51   : > { %1074 = shalt.err (!%p1071_p3)
}
  0x52   : > { %s1601_s15 = smov 4   ;;  %s1602_s20 = smov 64  }
  0x53   : > { %928 = dma.hbm_to_vmem [thread:$0]  (!%p1599_p6), %s1567_s4, 256, %s256_s13, [#allocation6], %s1602_s20, %s1602_s20, %s1601_s15  }
  0x54   : > { %s1075_s1 = scalar_lea.hbm %s1368_s21, 128  ;;  %s1080_s12 = scalar_lea.hbm %s1565_s2, 256 }
  0x55   : > { %p1076_p5 = scmp.ne.s32.totalorder %s1368_s21, %s1075_s1  ;;  %p1081_p1 = scmp.lt.s32.totalorder %s1368_s21, %s1565_s2 }
  0x56   : > { %p1082_p4 = scmp.lt.s32.totalorder %s1080_s12, %s1075_s1 }
  0x57   : > { %p1078_p9 = pnand %p1076_p5, %p1379_p10 }
  0x58   : > { %p1083_p8 = por %p1082_p4, %p1081_p1 }
  0x59   : > { %p1079_p13 = pneg %p1078_p9 }
  0x5b   : > { %p1084_p11 = pnand %p1083_p8, %p1079_p13 }
  0x5d   : > { %1087 = shalt.err (!%p1084_p11)
}
  0x5e   : > { %s1088_s13 = scalar_lea.vmem %s1402_s11, 128  ;;  %s1218_s23 = smov [#allocation7]  }
  0x5f   : > { %p1089_p6 = scmp.ne.s32.totalorder %s1402_s11, %s1088_s13  ;;  %s1093_s19 = sshll.u32 %s1218_s23, 4  ;;  %s1094_s19 = int_to_ptr.vmem [resolvable:$false] %s1093_s19 }
  0x60   : > { %s1095_s18 = scalar_lea.vmem %s1094_s19, 256  ;;  %p1096_p0 = scmp.lt.s32.totalorder %s1402_s11, %s1094_s19 }
  0x61   : > { %p1091_p12 = pnand %p1089_p6, %p1379_p10  ;;  %p1097_p3 = scmp.lt.s32.totalorder %s1095_s18, %s1088_s13 }
  0x63   : > { %p1092_p7 = pneg %p1091_p12  ;;  %p1098_p5 = por %p1097_p3, %p1096_p0 }
  0x65   : > { %p1099_p9 = pnand %p1098_p5, %p1092_p7 }
  0x67   : > { %1102 = shalt.err (!%p1099_p9)
}
  0x68   : > { %935 = dma.hbm_to_vmem [thread:$0]  (!%p1361_p2), %s1368_s21, 128, %s1402_s11, %s1373_s26, %s1602_s20, %s1602_s20, %s1601_s15  }
  0x69   : > { %s867_s10 = sshll.u32 %s1211_s27, 8  ;;  %s1603_s16 = sshll.u32 %s1350_s29, 4 }
  0x6a   : > { %s1444_s12 = scalar_lea.hbm %s1568_s5, %s867_s10  ;;  %s318_s13 = scalar_lea.vmem [#allocation9], %s1603_s16 }
  0x6b   : > { %s325_s23 = sshll.u32 %s318_s13, 4  ;;  %s315_s19 = scalar_lea.sflag [#allocation10], %s1350_s29  ;;  %s1448_s23 = int_to_ptr.vmem [resolvable:$true] %s325_s23 }
  0x6c   : > { %s1103_s18 = scalar_lea.hbm %s1444_s12, 256  ;;  %s1108_s11 = scalar_lea.hbm %s1568_s5, 512 }
  0x6d   : > { %p1104_p13 = scmp.ne.s32.totalorder %s1444_s12, %s1103_s18  ;;  %p1109_p8 = scmp.lt.s32.totalorder %s1444_s12, %s1568_s5 }
  0x6e   : > { %p1110_p11 = scmp.lt.s32.totalorder %s1108_s11, %s1103_s18 }
  0x6f   : > { %p1106_p1 = pnand %p1104_p13, %p1379_p10 }
  0x70   : > { %p1111_p6 = por %p1110_p11, %p1109_p8 }
  0x71   : > { %p1107_p4 = pneg %p1106_p1 }
  0x73   : > { %p1112_p12 = pnand %p1111_p6, %p1107_p4 }
  0x75   : > { %1115 = shalt.err (!%p1112_p12)
}
  0x76   : > { %s1116_s29 = scalar_lea.vmem %s1448_s23, 256  ;;  %s1219_s8 = smov [#allocation9]  }
  0x77   : > { %p1117_p7 = scmp.ne.s32.totalorder %s1448_s23, %s1116_s29  ;;  %s1121_s16 = sshll.u32 %s1219_s8, 4  ;;  %s1122_s16 = int_to_ptr.vmem [resolvable:$false] %s1121_s16 }
  0x78   : > { %s1123_s13 = scalar_lea.vmem %s1122_s16, 512  ;;  %p1124_p5 = scmp.lt.s32.totalorder %s1448_s23, %s1122_s16 }
  0x79   : > { %p1119_p0 = pnand %p1117_p7, %p1379_p10  ;;  %p1125_p9 = scmp.lt.s32.totalorder %s1123_s13, %s1116_s29 }
  0x7b   : > { %p1120_p3 = pneg %p1119_p0  ;;  %p1126_p13 = por %p1125_p9, %p1124_p5 }
  0x7d   : > { %p1127_p1 = pnand %p1126_p13, %p1120_p3 }
  0x7f   : > { %1130 = shalt.err (!%p1127_p1)
}
  0x80   : > { %938 = dma.hbm_to_vmem [thread:$0]  (!%p1361_p2), %s1444_s12, 256, %s1448_s23, %s315_s19, %s1602_s20, %s1602_s20, %s1601_s15  }
  0x81   : > { %p1604_p10 = scmp.ne.s32.totalorder %s1591_s9, 0 }
  0x82   : > { %s345_s14 = sand.u32 (!%p1604_p10), 1, %s1284_s28   ;;  %s1478_s18 = sand.u32 (!%p1604_p10), 1, %s1203_s25  }
  0x83   : > { %343 = sbr.rel (%p1604_p10) target bundleno = 579 (0x243), region = 48  ;;  %s1481_s26 = sshll.u32 (!%p1604_p10), %s1478_s18, 3 }
  0x84   : > { %s346_s17 = scalar_lea.sflag (!%p1604_p10), [#allocation3], %s345_s14  ;;  %s349_s21 = scalar_lea.vmem (!%p1604_p10), [#allocation2], %s1481_s26 }
  0x85   : > { %p1605_p4 = scmp.ne.s32.totalorder (!%p1604_p10), %s1588_s30, 0 }
  0x88   : > { %1174 = dma.done.wait (%p1605_p4), %s346_s17, 128  }
  0x89   : > { %1176 = vsyncadd (%p1605_p4), %s346_s17, 4294967168  ;;  %p1606_p2 = scmp.eq.s32.totalorder %s1284_s28, 0 }
  0x8b   : > { %1178 = dma.done.wait (%p1606_p2), [#allocation6], 128   ;;  %p1607_p8 = pmov %p1606_p2 }
  0x8c   : > { %s362_s9 = scalar_lea.vmem [#allocation7], %s1481_s26 }
  0x8d   : > { %1180 = vsyncadd (%p1607_p8), [#allocation6], 4294967168 }
  0x8e   : > { %1182 = dma.done.wait (%p1605_p4), %s346_s17, 128  }
  0x8f   : > { %1184 = vsyncadd (%p1605_p4), %s346_s17, 4294967168  ;;  %p1608_p11 = pmov %p1606_p2 }
  0x90   : > { %p1609_p6 = pmov %p1606_p2 }
  0x91   : > { %1186 = dma.done.wait (%p1608_p11), [#allocation6], 256  }
  0x92   : > { %1188 = vsyncadd (%p1609_p6), [#allocation6], 4294967040  ;;  %s848_s15 = sshll.u32 %s1478_s18, 4  ;;  %s372_s20 = scalar_lea.sflag [#allocation10], %s1478_s18 }
  0x93   : > { %s375_s12 = scalar_lea.vmem [#allocation9], %s848_s15 }
  0x94   : > { %1190 = dma.done.wait (%p1605_p4), %s372_s20, 256  }
  0x95   : > { %1192 = vsyncadd (%p1605_p4), %s372_s20, 4294967040  ;;  %v1220_v0 = vmov 0.0   ;;  %vm1221_vm0 = vmmov 0   ;;  %v987_v1 = vld [vmem:[%s362_s9] sm:$0xff]   ;;  %v988_v2 = vld [vmem:[#allocation5] sm:$0xff]   ;;  %vm441_vm1 = vcmask 130048  }
  0x96   : > { %878 = vmatprep.subr.bf16.mxu0 %v1220_v0  ;;  %884 = vmatprep.subr.bf16.mxu1 %v1220_v0  ;;  %v429_v3 = vld [vmem:[%s349_s21] sm:$0xff]  ;;  %v990_v6 = vld [vmem:[#allocation8 + $0x8] sm:$0xff]   ;;  %p422_p12 = scmp.lt.s32.totalorder %s1284_s28, 1  ;;  %vm561_vm2 = vcmask 261120   ;;  %s863_s8 = sshll.u32 %s1284_s28, 7 }
  0x97   : > { %880 = vmatprep.mubr.msk.bf16.mxu0 %vm1221_vm0, %v1220_v0  ;;  %886 = vmatprep.mubr.msk.bf16.mxu1 %vm1221_vm0, %v1220_v0  ;;  %v430_v4 = vpack.c.bf16 %v429_v3, %v429_v3  ;;  %v989_v5 = vld [vmem:[%s375_s12 + $0x8] sm:$0xff]   ;;  %v991_v7 = vld [vmem:[%s375_s12] sm:$0xff]   ;;  %s421_s16 = scalar_lea.vmem [#allocation11], %s1481_s26  ;;  %s1520_s21 = scalar_lea.hbm %s1570_s7, %s863_s8 }
  0x98   : > { %879 = vmatpush3.bf16.msra.mxu0 %v987_v1  ;;  %885 = vmatpush3.bf16.msra.mxu1 %v988_v2  ;;  %v992_v8 = vld [vmem:[#allocation8] sm:$0xff]   ;;  %s423_s30 = scalar_select %p422_p12, %s1284_s28, 1 }
  0x99   : > { %890 = vmatprep.subr.bf16.mxu0 %v1220_v0  ;;  %898 = vmatprep.subr.bf16.mxu1 %v1220_v0  ;;  %s680_s13 = sshll.u32 %s421_s16, 4  ;;  %s667_s28 = scalar_lea.sflag [#allocation4], %s1478_s18  ;;  %s1522_s13 = int_to_ptr.vmem [resolvable:$true] %s680_s13 }
  0x9a   : > { %s424_s11 = scalar_lea.vmem %s1566_s3, %s423_s30  ;;  %s427_s29 = scalar_lea.vmem %s1569_s6, %s423_s30 }
  0x9b   : > { %881 = vmatmul.mubr.msk.bf16.vlgmr.msra.gmra.mxu0 %vm441_vm1, %v430_v4  ;;  %887 = vmatmul.mubr.msk.bf16.vlgmr.msra.gmra.mxu1 %vm441_vm1, %v430_v4  ;;  %v854_v11 = vld [vmem:[%s424_s11] ss:$0 sm:$0xff]  ;;  %s1131_s26 = scalar_lea.vmem %s1522_s13, 128  ;;  %p1610_p0 = scmp.ne.s32.totalorder %s1596_s22, 0 }
  0x9c   : > { %894 = vmatprep.mubr.msk.bf16.mxu0 %vm1221_vm0, %v1220_v0  ;;  %902 = vmatprep.mubr.msk.bf16.mxu1 %vm1221_vm0, %v1220_v0  ;;  %v861_v24 = vld [vmem:[%s427_s29] ss:$0 sm:$0xff]  ;;  %p1132_p7 = scmp.ne.s32.totalorder %s1522_s13, %s1131_s26  ;;  %s1222_s9 = smov [#allocation11]  }
  0x9d   : > { %891 = vmatpush3.bf16.msra.mxu0 %v989_v5  ;;  %899 = vmatpush3.bf16.msra.mxu1 %v990_v6  ;;  %s1135_s15 = sshll.u32 %s1222_s9, 4  ;;  %s1136_s15 = int_to_ptr.vmem [resolvable:$false] %s1135_s15 }
  0x9e   : > { %892 = vmatprep.subr.bf16.mxu0 %v1220_v0  ;;  %900 = vmatprep.subr.bf16.mxu1 %v1220_v0  ;;  %p1133_p3 = pnand %p1132_p7, %p1610_p0  ;;  %s1137_s20 = scalar_lea.vmem %s1136_s15, 256 }
  0x9f   : > { %p1138_p9 = scmp.lt.s32.totalorder %s1522_s13, %s1136_s15  ;;  %p1139_p13 = scmp.lt.s32.totalorder %s1137_s20, %s1131_s26 }
  0xa0   : > { %p1134_p5 = pneg %p1133_p3 }
  0xa1   : > { %893 = vmatpush3.bf16.msra.mxu0 %v991_v7  ;;  %901 = vmatpush3.bf16.msra.mxu1 %v992_v8  ;;  %p1140_p1 = por %p1139_p13, %p1138_p9 }
  0xa3   : > { %p1141_p10 = pnand %p1140_p1, %p1134_p5 }
 0x15b   : > { %v479_v9 = vpop.f32.mrf.mxu0  ;;  %v525_v10 = vpop.f32.mrf.mxu1 }
 0x15c   : > { %v526_v12 = vadd.f32 %v525_v10, %v479_v9 }
 0x15d   : > { %v882_v13 = vpop.f32.mrf.mxu0  ;;  %v888_v14 = vpop.f32.mrf.mxu1 }
 0x15e   : > { %v538_v15 = vadd.f32 %v854_v11, %v526_v12 }
 0x15f   : > { %v482_v16 = vpop.f32.mrf.mxu0  ;;  %v528_v17 = vpop.f32.mrf.mxu1 }
 0x160   : > { %993 = vtanh.f32 %v538_v15 }
 0x161   : > { %v883_v18 = vpop.f32.mrf.mxu0  ;;  %v889_v19 = vpop.f32.mrf.mxu1 }
 0x16d   : > { %v994_v20 = vpop.eup %993 }
 0x16e   : > { %v540_v21 = vpack.c.bf16 %v994_v20, %v994_v20 }
 0x170   : > { %895 = vmatmul.mubr.msk.bf16.vlgmr.msra.gmra.mxu0 %vm561_vm2, %v540_v21  ;;  %903 = vmatmul.mubr.msk.bf16.vlgmr.msra.gmra.mxu1 %vm561_vm2, %v540_v21 }
 0x230   : > { %v599_v22 = vpop.f32.mrf.mxu0  ;;  %v651_v23 = vpop.f32.mrf.mxu1 }
 0x231   : > { %v652_v25 = vadd.f32 %v651_v23, %v599_v22 }
 0x232   : > { %v896_v26 = vpop.f32.mrf.mxu0  ;;  %v904_v27 = vpop.f32.mrf.mxu1 }
 0x233   : > { %v664_v28 = vadd.f32 %v861_v24, %v652_v25 }
 0x234   : > { %v602_v29 = vpop.f32.mrf.mxu0  ;;  %v654_v30 = vpop.f32.mrf.mxu1 }
 0x235   : > { %665 = vst [vmem:[%s421_s16] sm:$0xff] %v664_v28 }
 0x236   : > { %v897_v31 = vpop.f32.mrf.mxu0  ;;  %v905_v32 = vpop.f32.mrf.mxu1 }
 0x237   : > { %1144 = shalt.err (!%p1141_p10)
}
 0x238   : > { %s1145_s12 = scalar_lea.hbm %s1520_s21, 128  ;;  %s1149_s23 = scalar_lea.hbm %s1570_s7, 256 }
 0x239   : > { %p1146_p4 = scmp.ne.s32.totalorder %s1520_s21, %s1145_s12  ;;  %p1150_p11 = scmp.lt.s32.totalorder %s1520_s21, %s1570_s7 }
 0x23a   : > { %p1151_p6 = scmp.lt.s32.totalorder %s1149_s23, %s1145_s12 }
 0x23b   : > { %p1147_p2 = pnand %p1146_p4, %p1610_p0 }
 0x23c   : > { %p1152_p12 = por %p1151_p6, %p1150_p11 }
 0x23d   : > { %p1148_p8 = pneg %p1147_p2 }
 0x23f   : > { %p1153_p7 = pnand %p1152_p12, %p1148_p8 }
 0x241   : > { %1156 = shalt.err (!%p1153_p7)
}
 0x242   : > { %920 = dma.vmem_to_hbm [thread:$0]  (%p1610_p0), %s1522_s13, 128, %s1520_s21, %s667_s28  }
 0x243 PF: > { %s1611_s10 = sld [smem:[#allocation19_spill]]  ;;  %s692_s1 = sand.u32 1, %s1199_s24  }
 0x244   : > { %p1613_p5 = scmp.ge.s32.totalorder %s1211_s27, 2  ;;  %s693_s29 = scalar_lea.sflag [#allocation4], %s692_s1 }
 0x249   : > { %p1612_p3 = scmp.ne.s32.totalorder %s1611_s10, 0 }
 0x24b   : > { %p940_p9 = pnand %p1613_p5, %p1612_p3 }
 0x24d   : > { %p941_p13 = pneg %p940_p9 }
 0x24f   : > { %1194 = dma.done.wait (%p941_p13), %s693_s29, 128  }
 0x250   : > { %1196 = vsyncadd (%p941_p13), %s693_s29, 4294967168  ;;  %s1614_s27 = sld [smem:[#allocation20_spill]]  ;;  %s1617_s24 = smov %s1203_s25 }
 0x251   : > { %s1615_s8 = sld [smem:[#allocation18_spill]] }
 0x252   : > { %s1616_s26 = sld [smem:[#allocation21_spill]] }
 0x256   : > { %p24_p1 = scmp.ge.s32.totalorder %s1614_s27, 4  }
 0x257   : > { %s1618_s25 = smov %s1615_s8 }
 0x258   :  { %26 = sbr.rel (!%p24_p1) target bundleno = 10 (0xa), region = 131 }
 0x25d   :  { %698 = vsyncpa [#allocation3], 1 }
 0x25e   :  { %700 = vsyncpa [#allocation3 + $0x1], 1 }
 0x25f   :  { %701 = vsyncpa [#allocation6], 1 }
 0x260   :  { %702 = vsyncpa [#allocation10], 1 }
 0x261   :  { %704 = vsyncpa [#allocation10 + $0x1], 1 }
 0x262   :  { %705 = vsyncpa [#allocation4], 1 }
 0x263   :  { %707 = vsyncpa [#allocation4 + $0x1], 1 }

</bundles_post_ra>
